<compile_context>
chip_gen: v5e
topology: v5e:2x2
jax: 0.10.0
libtpu: 0.0.40
codegen_flags: <defaults>
</compile_context>

<pallas_src>
import functools
import math

import jax
import jax.numpy as jnp
import numpy as np
from jax.experimental import pallas as pl
from jax.experimental.pallas import tpu as pltpu


def _round_up(v, m):
    return ((v + m - 1) // m) * m


# ---------------------------------------------------------------------------
# Kernel 1: hidden = x @ W + b   (computed once, emitted in bf16)
# ---------------------------------------------------------------------------
def linear_kernel(x_ref, w_ref, b_ref, h_ref):
    h = jnp.dot(x_ref[...], w_ref[...], preferred_element_type=jnp.float32)
    h_ref[...] = (h + b_ref[...]).astype(h_ref.dtype)
    # TODO(synk): training-mode dropout (F.dropout on hidden) not implemented; eval = identity.


# ---------------------------------------------------------------------------
# Kernel 2: out = act(adj @ hidden), adjacency streamed block-by-block with
#           all-zero adjacency blocks skipped via scalar-prefetched indices.
# ---------------------------------------------------------------------------
def gcn_kernel(blk_idx_ref, blk_cnt_ref, adj_ref, hid_ref, out_ref, *,
               tile_k, hidden_resident, act):
    i = pl.program_id(0)
    k = pl.program_id(1)

    @pl.when(k == 0)
    def _():
        out_ref[...] = jnp.zeros_like(out_ref)

    # Only the first blk_cnt[i] steps carry a nonzero adjacency block; padded steps
    # re-reference the previous block (no new DMA) and skip the matmul entirely.
    @pl.when(k < blk_cnt_ref[i])
    def _():
        if hidden_resident:
            col = blk_idx_ref[i, k]
            h = hid_ref[pl.ds(pl.multiple_of(col * tile_k, tile_k), tile_k), :]
        else:
            h = hid_ref[...]
        out_ref[...] += jnp.dot(adj_ref[...], h,
                                preferred_element_type=jnp.float32)

    @pl.when(k == pl.num_programs(1) - 1)
    def _():
        out_ref[...] = act(out_ref[...]).astype(out_ref.dtype)


def gcn_forward(x, adj, W, b=None, *, act=jax.nn.relu, tile_m=256, tile_k=512):
    """Returns (act(adj @ (x @ W + b)), adj).

    x: (N, Fin), adj: (N, N) dense, W: (Fin, Fout), b: (Fout,) or None.
    """
    N, Fin = x.shape
    Fout = W.shape[1]
    if b is None:
        b = jnp.zeros((Fout,), dtype=jnp.float32)
    b2 = b.reshape(1, Fout).astype(jnp.float32)

    # Always pad the node dim up to lcm(tile_m, tile_k) (no small-tile fallback).
    pad_to = (tile_m * tile_k) // math.gcd(tile_m, tile_k)
    Np = _round_up(N, pad_to)
    Rt = Np // tile_m          # even whenever tile_m | tile_k (good for v7x megacore)
    Ct = Np // tile_k

    x_p = jnp.pad(x.astype(jnp.float32), ((0, Np - N), (0, 0)))
    # Single fused pad+cast pass; bf16 halves the dominant N^2 HBM stream.
    adj_p = jnp.pad(adj, ((0, Np - N), (0, Np - N))).astype(jnp.bfloat16)

    # ---- hidden = x @ W + b (one MXU pass; padded rows only hold the bias and are
    # multiplied by all-zero adjacency columns, so they never contribute).
    hidden = pl.pallas_call(
        linear_kernel,
        out_shape=jax.ShapeDtypeStruct((Np, Fout), jnp.bfloat16),
        grid=(Rt,),
        in_specs=[
            pl.BlockSpec((tile_m, Fin), lambda i: (i, 0)),
            pl.BlockSpec((Fin, Fout), lambda i: (0, 0)),
            pl.BlockSpec((1, Fout), lambda i: (0, 0)),
        ],
        out_specs=pl.BlockSpec((tile_m, Fout), lambda i: (i, 0)),
        compiler_params=pltpu.CompilerParams(dimension_semantics=("parallel",)),
    )(x_p, W.astype(jnp.float32), b2)

    # ---- block-sparsity metadata: nonzero (tile_m x tile_k) adjacency blocks come
    # first; padded entries repeat the last valid block so their DMA is a revisit.
    nz = jnp.any(adj_p.reshape(Rt, tile_m, Ct, tile_k) != 0, axis=(1, 3))
    cnt = nz.sum(axis=1).astype(jnp.int32)                            # (Rt,)
    order = jnp.argsort(jnp.where(nz, 0, 1), axis=1)                  # nz blocks first
    last_valid = jnp.take_along_axis(
        order, jnp.maximum(cnt - 1, 0)[:, None], axis=1)              # (Rt, 1)
    pos = jnp.arange(Ct, dtype=jnp.int32)[None, :]
    blk_idx = jnp.where(pos < cnt[:, None], order, last_valid).astype(jnp.int32)

    # ---- keep hidden fully VMEM-resident when it fits a v7x-safe budget.
    hidden_resident = (Np * Fout * 2) <= (16 << 20)
    if hidden_resident:
        hid_spec = pl.BlockSpec((Np, Fout), lambda i, k, bi, bc: (0, 0))
        hid_bytes = Np * Fout * 2
    else:
        hid_spec = pl.BlockSpec((tile_k, Fout), lambda i, k, bi, bc: (bi[i, k], 0))
        hid_bytes = 2 * tile_k * Fout * 2

    vmem_need = (2 * tile_m * tile_k * 2        # adj double buffer (bf16)
                 + 2 * tile_m * Fout * 4        # output block (f32)
                 + 2 * hid_bytes
                 + (2 << 20))                   # slack
    vmem_limit = int(min(max(vmem_need, 32 << 20), 64 << 20))

    kernel = functools.partial(
        gcn_kernel, tile_k=tile_k, hidden_resident=hidden_resident, act=act)

    out = pl.pallas_call(
        kernel,
        out_shape=jax.ShapeDtypeStruct((Np, Fout), jnp.float32),
        grid_spec=pltpu.PrefetchScalarGridSpec(
            num_scalar_prefetch=2,
            grid=(Rt, Ct),
            in_specs=[
                pl.BlockSpec((tile_m, tile_k), lambda i, k, bi, bc: (i, bi[i, k])),
                hid_spec,
            ],
            out_specs=pl.BlockSpec((tile_m, Fout), lambda i, k, bi, bc: (i, 0)),
        ),
        compiler_params=pltpu.CompilerParams(
            dimension_semantics=("parallel", "arbitrary"),
            vmem_limit_bytes=vmem_limit,
        ),
    )(blk_idx, cnt, adj_p, hidden)

    return out[:N], adj


def _reference(x, adj, W, b, act):
    hidden = x @ W + b
    return act(adj @ hidden)


if __name__ == "__main__":
    # Small, module-consistent shapes.  Two disconnected communities so some
    # (tile_m x tile_k) adjacency blocks are all-zero and the block-skip path runs;
    # N=768 pads to Np=1024 -> grid (4, 2), last row tile is pure padding (cnt=0).
    N = 768
    in_features = 64
    out_features = 128   # lane-dense output

    key = jax.random.PRNGKey(0)
    kx, kw, kb = jax.random.split(key, 3)

    x = jax.random.normal(kx, (N, in_features), dtype=jnp.float32)

    # Deterministic graph: two communities (0..383, 384..767); within each, self loops
    # + ring neighbours, symmetrically normalized D^-1/2 A D^-1/2.
    half = N // 2
    adj01 = np.zeros((N, N), dtype=np.float32)
    for base in (0, half):
        for li in range(half):
            i = base + li
            for lj in (li, (li + 1) % half, (li - 1) % half, (li + 5) % half):
                adj01[i, base + lj] = 1.0
    deg = adj01.sum(axis=1)
    d_inv_sqrt = 1.0 / np.sqrt(deg)
    adj_np = adj01 * d_inv_sqrt[:, None] * d_inv_sqrt[None, :]
    adj = jnp.asarray(adj_np)

    # Linear init (xavier-like scale) + small bias.
    w_std = np.sqrt(2.0 / (in_features + out_features))
    W = w_std * jax.random.normal(kw, (in_features, out_features), dtype=jnp.float32)
    b = 0.1 * jax.random.normal(kb, (out_features,), dtype=jnp.float32)

    out, adj_out = gcn_forward(x, adj, W, b, act=jax.nn.relu)
    out = jax.block_until_ready(out)

    ref = _reference(x, adj, W, b, jax.nn.relu)
    assert out.shape == (N, out_features)
    assert adj_out.shape == (N, N)
    assert bool(jnp.all(jnp.isfinite(out)))
    # bf16 adjacency/hidden stream with f32 accumulation -> relaxed tolerance.
    np.testing.assert_allclose(np.asarray(out), np.asarray(ref), rtol=3e-2, atol=3e-2)

    print("KERNEL_OK")
</pallas_src>

<mosaic_0001>
module attributes {stable_mosaic.version = 11 : i64} {
  func.func @linear_kernel(%arg0: i32, %arg1: memref<256x64xf32, #tpu.memory_space<vmem>>, %arg2: memref<64x128xf32, #tpu.memory_space<vmem>>, %arg3: memref<1x128xf32, #tpu.memory_space<vmem>>, %arg4: memref<256x128xbf16, #tpu.memory_space<vmem>>) attributes {dimension_semantics = [#tpu.dimension_semantics<parallel>], iteration_bounds = array<i64: 4>, scalar_prefetch = 0 : i64, scratch_operands = 0 : i64, tpu.core_type = #tpu.core_type<tc>, window_params = [{transform_indices = @transform_0, window_bounds = array<i64: 256, 64>}, {pipeline_mode = #tpu.pipeline_mode<synchronous>, transform_indices = @transform_1, window_bounds = array<i64: 64, 128>}, {pipeline_mode = #tpu.pipeline_mode<synchronous>, transform_indices = @transform_2, window_bounds = array<i64: 1, 128>}, {transform_indices = @transform_3, window_bounds = array<i64: 256, 128>}]} {
    %c0 = arith.constant 0 : index
    %c0_0 = arith.constant 0 : index
    %0 = vector.load %arg1[%c0, %c0_0] : memref<256x64xf32, #tpu.memory_space<vmem>>, vector<256x64xf32>
    %c0_1 = arith.constant 0 : index
    %c0_2 = arith.constant 0 : index
    %1 = vector.load %arg2[%c0_1, %c0_2] : memref<64x128xf32, #tpu.memory_space<vmem>>, vector<64x128xf32>
    %cst = arith.constant dense<0.000000e+00> : vector<256x128xf32>
    %2 = tpu.matmul %0, %1, %cst {dimension_numbers = #tpu.dot_dimension_numbers<[1], [0], [0], [1], [0, 0, 1, 1], [], []>} : vector<256x64xf32>, vector<64x128xf32>, vector<256x128xf32> -> vector<256x128xf32>
    %c0_3 = arith.constant 0 : index
    %c0_4 = arith.constant 0 : index
    %3 = vector.load %arg3[%c0_3, %c0_4] : memref<1x128xf32, #tpu.memory_space<vmem>>, vector<1x128xf32>
    %4 = vector.broadcast %3 : vector<1x128xf32> to vector<256x128xf32>
    %5 = arith.addf %2, %4 : vector<256x128xf32>
    %6 = arith.truncf %5 : vector<256x128xf32> to vector<256x128xbf16>
    %c0_5 = arith.constant 0 : index
    %c0_6 = arith.constant 0 : index
    %7 = vector.load %arg4[%c0_5, %c0_6] : memref<256x128xbf16, #tpu.memory_space<vmem>>, vector<256x128xbf16>
    tpu.vector_store %arg4[%c0_5, %c0_6], %6 {strides = array<i32>} : memref<256x128xbf16, #tpu.memory_space<vmem>>, vector<256x128xbf16>,
    return
  }
  func.func @transform_0(%arg0: i32) -> (i32, i32) {
    %c0_i32 = arith.constant 0 : i32
    %c0_i32_0 = arith.constant 0 : i32
    return %arg0, %c0_i32 : i32, i32
  }
  func.func @transform_1(%arg0: i32) -> (i32, i32) {
    %c0_i32 = arith.constant 0 : i32
    %c0_i32_0 = arith.constant 0 : i32
    %c0_i32_1 = arith.constant 0 : i32
    return %c0_i32, %c0_i32_0 : i32, i32
  }
  func.func @transform_2(%arg0: i32) -> (i32, i32) {
    %c0_i32 = arith.constant 0 : i32
    %c0_i32_0 = arith.constant 0 : i32
    %c0_i32_1 = arith.constant 0 : i32
    return %c0_i32, %c0_i32_0 : i32, i32
  }
  func.func @transform_3(%arg0: i32) -> (i32, i32) {
    %c0_i32 = arith.constant 0 : i32
    %c0_i32_0 = arith.constant 0 : i32
    return %arg0, %c0_i32 : i32, i32
  }
}

</mosaic_0001>

<bundles_post_ra>
// kernel: tpu_custom_call.1
= control target key start
LH: loop header
LB: loop body
LE: loop exit
PB: predicated region body
PF: predicated region fallthrough
CT: control target
= control target key end

     0   :  { %8 = vsyncpa [#allocation3], 0  ;;  %s1094_s0 = inlined_call_operand.vmem [shape: f32[1024,64], index: 0, kind: input, shape index: {}]   ;;  %s1095_s1 = inlined_call_operand.vmem [shape: f32[64,128], index: 1, kind: input, shape index: {}]   ;;  %s1096_s2 = inlined_call_operand.vmem [shape: f32[1,128], index: 2, kind: input, shape index: {}]   ;;  %s1097_s3 = inlined_call_operand.hbm [shape: bf16[1024,128], index: 3, kind: output, shape index: {}]  }
   0x1   :  { %10 = vsyncpa [#allocation3 + $0x1], 0  ;;  %s860_s12 = smov 0   ;;  %s862_s13 = smov 0  }
   0x2   :  { %s864_s14 = smov 0   ;;  %s866_s15 = smov 0  }
   0x3 LB: > { %s881_s16 = sadd.s32 4294967295, %s836_s15   ;;  %s568_s17 = sadd.s32 4294967294, %s836_s15   ;;  %s836_s15 = sphi %s866_s15, %s1103_s15   ;;  %s832_s14 = sphi %s864_s14, %s1102_s14   ;;  %s828_s13 = sphi %s862_s13, %s1101_s13   ;;  %s824_s12 = sphi %s860_s12, %s1100_s12  }
   0x4   : > { %s885_s18 = sadd.s32 1, %s836_s15   ;;  %s91_s19 = sadd.s32 1, %s832_s14 }
   0x5   : > { %s88_s20 = ssub.s32 %s836_s15, %s885_s18  ;;  %p101_p0 = scmp.ne.s32.totalorder %s832_s14, %s828_s13 }
   0x6   : > { %p89_p1 = scmp.eq.s32.totalorder %s88_s20, 0  ;;  %p102_p2 = scmp.eq.s32.totalorder %s881_s16, 3 }
   0x7   : > { %p107_p3 = scmp.ne.s32.totalorder %s828_s13, %s824_s12  ;;  %p108_p4 = scmp.eq.s32.totalorder %s568_s17, 3 }
   0x8   : > { %s896_s21 = scalar_select %p89_p1, %s832_s14, %s91_s19  }
   0x9   : > { %p898_p5 = por %p102_p2, %p101_p0  ;;  %p902_p6 = por %p108_p4, %p107_p3 }
   0xa   : > { %p571_p7 = scmp.ge.s32.totalorder %s836_s15, 1  ;;  %p141_p8 = scmp.lt.s32.totalorder %s836_s15, 5 }
   0xc   : > { %p142_p9 = pnand %p571_p7, %p141_p8 }
   0xd   : > { %s573_s28 = sshll.u32 (!%p142_p9), %s881_s16, 5  ;;  %s162_s27 = sand.u32 (!%p142_p9), 1, %s828_s13  }
   0xe   : > { %145 = sbr.rel (%p142_p9) target bundleno = 234 (0xea), region = 32  ;;  %p166_p10 = scmp.lt.s32.totalorder (!%p142_p9), %s573_s28, 127 }
   0xf   : > { %s572_s30 = sshll.u32 (!%p142_p9), %s162_s27, 7  ;;  %s612_s5 = sshll.u32 (!%p142_p9), %s881_s16, 7 }
  0x10   : > { %s1014_s4 = scalar_lea.vmem (!%p142_p9), [#allocation2], %s572_s30  ;;  %s502_s8 = scalar_lea.hbm (!%p142_p9), %s1097_s3, %s612_s5 }
  0x11   : > { %s503_s9 = sshll.u32 (!%p142_p9), %s1014_s4, 4  ;;  %s491_s16 = scalar_lea.sflag (!%p142_p9), [#allocation3], %s162_s27  ;;  %s504_s9 = int_to_ptr.vmem [resolvable:$true] %s503_s9 }
  0x13   : > { %v211_v0 = vld [vmem:[%s1095_s1 + $0x38] sm:$0xff]  ;;  %v210_v1 = vld [vmem:[%s1095_s1 + $0x30] sm:$0xff]  ;;  %v209_v2 = vld [vmem:[%s1095_s1 + $0x28] sm:$0xff]  ;;  %s1105_s28 = smov (!%p166_p10, %s573_s28), 127  ;;  %vm216_vm0 = vcmask 523264  }
  0x14   : > { %321 = vmatpush.msra.mxu0 %v211_v0  ;;  %708 = vmatpush.msra.mxu1 %v211_v0  ;;  %v208_v3 = vld [vmem:[%s1095_s1 + $0x20] sm:$0xff]  ;;  %v207_v4 = vld [vmem:[%s1095_s1 + $0x18] sm:$0xff]  ;;  %v206_v5 = vld [vmem:[%s1095_s1 + $0x10] sm:$0xff]  ;;  %s574_s10 = sshll.u32 %s1105_s28, 3 }
  0x15   : > { %709 = vmatpush.msra.mxu2 %v211_v0  ;;  %710 = vmatpush.msra.mxu3 %v211_v0  ;;  %v205_v6 = vld [vmem:[%s1095_s1 + $0x8] sm:$0xff]  ;;  %s933_s24 = scalar_lea.vmem %s1094_s0, %s574_s10  ;;  %v204_v7 = vld [vmem:[%s1095_s1] sm:$0xff]  ;;  %s505_s10 = sshll.u32 %s502_s8, 4  ;;  %s506_s10 = int_to_ptr.hbm [resolvable:$true] %s505_s10 }
  0x16   : > { %322 = vmatpush.msra.mxu0 %v210_v1  ;;  %711 = vmatpush.msra.mxu1 %v210_v1  ;;  %v172_v8 = vld [vmem:[%s933_s24] sm:$0xff]  ;;  %v173_v12 = vld [vmem:[%s933_s24 + $0x8] sm:$0xff]  ;;  %v174_v16 = vld [vmem:[%s933_s24 + $0x10] sm:$0xff]  ;;  %s788_s11 = sshra.s32 %s506_s10, 4  ;;  %s789_s11 = int_to_ptr.hbm [resolvable:$true] %s788_s11 }
  0x17   : > { %712 = vmatpush.msra.mxu2 %v210_v1  ;;  %713 = vmatpush.msra.mxu3 %v210_v1  ;;  %v180_v9 = vld [vmem:[%s933_s24 + $0x40] sm:$0xff]  ;;  %v181_v13 = vld [vmem:[%s933_s24 + $0x48] sm:$0xff]  ;;  %v182_v17 = vld [vmem:[%s933_s24 + $0x50] sm:$0xff]  ;;  %s790_s17 = scalar_lea.hbm %s789_s11, 128  ;;  %p795_p0 = scmp.lt.s32.totalorder %s789_s11, %s1097_s3 }
  0x18   : > { %323 = vmatpush.msra.mxu0 %v209_v2  ;;  %714 = vmatpush.msra.mxu1 %v209_v2  ;;  %v188_v10 = vld [vmem:[%s933_s24 + $0x80] sm:$0xff]  ;;  %v189_v14 = vld [vmem:[%s933_s24 + $0x88] sm:$0xff]  ;;  %v190_v18 = vld [vmem:[%s933_s24 + $0x90] sm:$0xff]  ;;  %p791_p11 = scmp.ne.s32.totalorder %s789_s11, %s790_s17 }
  0x19   : > { %715 = vmatpush.msra.mxu2 %v209_v2  ;;  %716 = vmatpush.msra.mxu3 %v209_v2  ;;  %v196_v11 = vld [vmem:[%s933_s24 + $0xc0] sm:$0xff]  ;;  %v197_v15 = vld [vmem:[%s933_s24 + $0xc8] sm:$0xff]  ;;  %v198_v19 = vld [vmem:[%s933_s24 + $0xd0] sm:$0xff] }
  0x1a   : > { %324 = vmatpush.msra.mxu0 %v208_v3  ;;  %717 = vmatpush.msra.mxu1 %v208_v3  ;;  %v175_v20 = vld [vmem:[%s933_s24 + $0x18] sm:$0xff]  ;;  %v176_v24 = vld [vmem:[%s933_s24 + $0x20] sm:$0xff]  ;;  %v177_v28 = vld [vmem:[%s933_s24 + $0x28] sm:$0xff]  ;;  %p792_p12 = pnand %p791_p11, %p898_p5 }
  0x1b   : > { %718 = vmatpush.msra.mxu2 %v208_v3  ;;  %719 = vmatpush.msra.mxu3 %v208_v3  ;;  %v183_v21 = vld [vmem:[%s933_s24 + $0x58] sm:$0xff]  ;;  %v184_v25 = vld [vmem:[%s933_s24 + $0x60] sm:$0xff]  ;;  %v185_v29 = vld [vmem:[%s933_s24 + $0x68] sm:$0xff] }
  0x1c   : > { %325 = vmatpush.msra.mxu0 %v207_v4  ;;  %720 = vmatpush.msra.mxu1 %v207_v4  ;;  %v191_v22 = vld [vmem:[%s933_s24 + $0x98] sm:$0xff]  ;;  %v192_v26 = vld [vmem:[%s933_s24 + $0xa0] sm:$0xff]  ;;  %v193_v30 = vld [vmem:[%s933_s24 + $0xa8] sm:$0xff]  ;;  %p793_p13 = pneg %p792_p12 }
  0x1d   : > { %721 = vmatpush.msra.mxu2 %v207_v4  ;;  %722 = vmatpush.msra.mxu3 %v207_v4  ;;  %v199_v23 = vld [vmem:[%s933_s24 + $0xd8] sm:$0xff]  ;;  %v200_v27 = vld [vmem:[%s933_s24 + $0xe0] sm:$0xff]  ;;  %v201_v31 = vld [vmem:[%s933_s24 + $0xe8] sm:$0xff] }
  0x1e   : > { %326 = vmatpush.msra.mxu0 %v206_v5  ;;  %723 = vmatpush.msra.mxu1 %v206_v5  ;;  %v178_v32 = vld [vmem:[%s933_s24 + $0x30] sm:$0xff]  ;;  %v179_v36 = vld [vmem:[%s933_s24 + $0x38] sm:$0xff]  ;;  %v1006_v42 = vld [vmem:[%s1096_s2] ss:$0 sm:$0xff] }
  0x1f   : > { %724 = vmatpush.msra.mxu2 %v206_v5  ;;  %725 = vmatpush.msra.mxu3 %v206_v5  ;;  %v186_v33 = vld [vmem:[%s933_s24 + $0x70] sm:$0xff]  ;;  %v187_v37 = vld [vmem:[%s933_s24 + $0x78] sm:$0xff] }
  0x20   : > { %327 = vmatpush.msra.mxu0 %v205_v6  ;;  %726 = vmatpush.msra.mxu1 %v205_v6  ;;  %v194_v34 = vld [vmem:[%s933_s24 + $0xb0] sm:$0xff]  ;;  %v195_v38 = vld [vmem:[%s933_s24 + $0xb8] sm:$0xff] }
  0x21   : > { %727 = vmatpush.msra.mxu2 %v205_v6  ;;  %728 = vmatpush.msra.mxu3 %v205_v6  ;;  %v202_v35 = vld [vmem:[%s933_s24 + $0xf0] sm:$0xff]  ;;  %v203_v39 = vld [vmem:[%s933_s24 + $0xf8] sm:$0xff]  ;;  %s794_s24 = scalar_lea.hbm %s1097_s3, 512 }
  0x22   : > { %328 = vmatpush.msra.mxu0 %v204_v7  ;;  %729 = vmatpush.msra.mxu1 %v204_v7  ;;  %p796_p1 = scmp.lt.s32.totalorder %s794_s24, %s790_s17 }
  0x23   : > { %730 = vmatpush.msra.mxu2 %v204_v7  ;;  %731 = vmatpush.msra.mxu3 %v204_v7 }
  0x24   : > { %575 = vmatmul.msk.f32.vlgmr.msra.gmra.mxu0 %vm216_vm0, %v172_v8  ;;  %583 = vmatmul.msk.f32.vlgmr.msra.gmra.mxu1 %vm216_vm0, %v180_v9  ;;  %p797_p2 = por %p796_p1, %p795_p0 }
  0x25   : > { %591 = vmatmul.msk.f32.vlgmr.msra.gmra.mxu2 %vm216_vm0, %v188_v10  ;;  %599 = vmatmul.msk.f32.vlgmr.msra.gmra.mxu3 %vm216_vm0, %v196_v11 }
  0x26   : > { %p798_p3 = pnand %p797_p2, %p793_p13 }
  0x2c   : > { %576 = vmatmul.msk.f32.gmra.mxu0 %vm216_vm0, %v173_v12  ;;  %584 = vmatmul.msk.f32.gmra.mxu1 %vm216_vm0, %v181_v13 }
  0x2d   : > { %592 = vmatmul.msk.f32.gmra.mxu2 %vm216_vm0, %v189_v14  ;;  %600 = vmatmul.msk.f32.gmra.mxu3 %vm216_vm0, %v197_v15 }
  0x34   : > { %577 = vmatmul.msk.f32.gmra.mxu0 %vm216_vm0, %v174_v16  ;;  %585 = vmatmul.msk.f32.gmra.mxu1 %vm216_vm0, %v182_v17 }
  0x35   : > { %593 = vmatmul.msk.f32.gmra.mxu2 %vm216_vm0, %v190_v18  ;;  %601 = vmatmul.msk.f32.gmra.mxu3 %vm216_vm0, %v198_v19 }
  0x3c   : > { %578 = vmatmul.msk.f32.gmra.mxu0 %vm216_vm0, %v175_v20  ;;  %586 = vmatmul.msk.f32.gmra.mxu1 %vm216_vm0, %v183_v21 }
  0x3d   : > { %594 = vmatmul.msk.f32.gmra.mxu2 %vm216_vm0, %v191_v22  ;;  %602 = vmatmul.msk.f32.gmra.mxu3 %vm216_vm0, %v199_v23 }
  0x44   : > { %579 = vmatmul.msk.f32.gmra.mxu0 %vm216_vm0, %v176_v24  ;;  %587 = vmatmul.msk.f32.gmra.mxu1 %vm216_vm0, %v184_v25 }
  0x45   : > { %595 = vmatmul.msk.f32.gmra.mxu2 %vm216_vm0, %v192_v26  ;;  %603 = vmatmul.msk.f32.gmra.mxu3 %vm216_vm0, %v200_v27 }
  0x4c   : > { %580 = vmatmul.msk.f32.gmra.mxu0 %vm216_vm0, %v177_v28  ;;  %588 = vmatmul.msk.f32.gmra.mxu1 %vm216_vm0, %v185_v29 }
  0x4d   : > { %596 = vmatmul.msk.f32.gmra.mxu2 %vm216_vm0, %v193_v30  ;;  %604 = vmatmul.msk.f32.gmra.mxu3 %vm216_vm0, %v201_v31 }
  0x54   : > { %581 = vmatmul.msk.f32.gmra.mxu0 %vm216_vm0, %v178_v32  ;;  %589 = vmatmul.msk.f32.gmra.mxu1 %vm216_vm0, %v186_v33 }
  0x55   : > { %597 = vmatmul.msk.f32.gmra.mxu2 %vm216_vm0, %v194_v34  ;;  %605 = vmatmul.msk.f32.gmra.mxu3 %vm216_vm0, %v202_v35 }
  0x5c   : > { %582 = vmatmul.msk.f32.gmra.mxu0 %vm216_vm0, %v179_v36  ;;  %590 = vmatmul.msk.f32.gmra.mxu1 %vm216_vm0, %v187_v37 }
  0x5d   : > { %598 = vmatmul.msk.f32.gmra.mxu2 %vm216_vm0, %v195_v38  ;;  %606 = vmatmul.msk.f32.gmra.mxu3 %vm216_vm0, %v203_v39 }
  0xa1   : > { %v330_v40 = vpop.f32.mrf.mxu0  ;;  %v354_v41 = vpop.f32.mrf.mxu1 }
  0xa2   : > { %v331_v47 = vadd.f32 %v1006_v42, %v330_v40  ;;  %v355_v48 = vadd.f32 %v1006_v42, %v354_v41 }
  0xa8   : > { %v378_v43 = vpop.f32.mrf.mxu2  ;;  %v402_v44 = vpop.f32.mrf.mxu3 }
  0xa9   : > { %v333_v45 = vpop.f32.mrf.mxu0  ;;  %v357_v46 = vpop.f32.mrf.mxu1  ;;  %v379_v55 = vadd.f32 %v1006_v42, %v378_v43  ;;  %v403_v56 = vadd.f32 %v1006_v42, %v402_v44 }
  0xaa   : > { %v334_v49 = vadd.f32 %v1006_v42, %v333_v45  ;;  %v358_v50 = vadd.f32 %v1006_v42, %v357_v46 }
  0xac   : > { %v616_v51 = vpack.c.bf16 %v334_v49, %v331_v47  ;;  %v636_v52 = vpack.c.bf16 %v358_v50, %v355_v48 }
  0xae   : > { %617 = vst [vmem:[%s1014_s4] sm:$0xff] %v616_v51  }
  0xaf   : > { %696 = vst [vmem:[%s1014_s4 + $0x20] sm:$0xff] %v636_v52  }
  0xb0   : > { %v381_v53 = vpop.f32.mrf.mxu2  ;;  %v405_v54 = vpop.f32.mrf.mxu3 }
  0xb1   : > { %v382_v57 = vadd.f32 %v1006_v42, %v381_v53  ;;  %v406_v58 = vadd.f32 %v1006_v42, %v405_v54  ;;  %v336_v59 = vpop.f32.mrf.mxu0  ;;  %v360_v60 = vpop.f32.mrf.mxu1 }
  0xb2   : > { %v337_v3 = vadd.f32 %v1006_v42, %v336_v59  ;;  %v361_v4 = vadd.f32 %v1006_v42, %v360_v60 }
  0xb3   : > { %v656_v61 = vpack.c.bf16 %v382_v57, %v379_v55  ;;  %v676_v62 = vpack.c.bf16 %v406_v58, %v403_v56 }
  0xb5   : > { %700 = vst [vmem:[%s1014_s4 + $0x40] sm:$0xff] %v656_v61  }
  0xb6   : > { %704 = vst [vmem:[%s1014_s4 + $0x60] sm:$0xff] %v676_v62  }
  0xb8   : > { %v384_v63 = vpop.f32.mrf.mxu2  ;;  %v408_v0 = vpop.f32.mrf.mxu3 }
  0xb9   : > { %v339_v1 = vpop.f32.mrf.mxu0  ;;  %v363_v2 = vpop.f32.mrf.mxu1  ;;  %v385_v11 = vadd.f32 %v1006_v42, %v384_v63  ;;  %v409_v12 = vadd.f32 %v1006_v42, %v408_v0 }
  0xba   : > { %v340_v5 = vadd.f32 %v1006_v42, %v339_v1  ;;  %v364_v6 = vadd.f32 %v1006_v42, %v363_v2 }
  0xbc   : > { %v621_v7 = vpack.c.bf16 %v340_v5, %v337_v3  ;;  %v641_v8 = vpack.c.bf16 %v364_v6, %v361_v4 }
  0xbe   : > { %693 = vst [vmem:[%s1014_s4 + $0x8] sm:$0xff] %v621_v7  }
  0xbf   : > { %697 = vst [vmem:[%s1014_s4 + $0x28] sm:$0xff] %v641_v8  }
  0xc0   : > { %v387_v9 = vpop.f32.mrf.mxu2  ;;  %v411_v10 = vpop.f32.mrf.mxu3 }
  0xc1   : > { %v388_v13 = vadd.f32 %v1006_v42, %v387_v9  ;;  %v412_v14 = vadd.f32 %v1006_v42, %v411_v10  ;;  %v342_v15 = vpop.f32.mrf.mxu0  ;;  %v366_v16 = vpop.f32.mrf.mxu1 }
  0xc2   : > { %v343_v23 = vadd.f32 %v1006_v42, %v342_v15  ;;  %v367_v24 = vadd.f32 %v1006_v42, %v366_v16 }
  0xc3   : > { %v661_v17 = vpack.c.bf16 %v388_v13, %v385_v11  ;;  %v681_v18 = vpack.c.bf16 %v412_v14, %v409_v12 }
  0xc5   : > { %701 = vst [vmem:[%s1014_s4 + $0x48] sm:$0xff] %v661_v17  }
  0xc6   : > { %705 = vst [vmem:[%s1014_s4 + $0x68] sm:$0xff] %v681_v18  }
  0xc8   : > { %v390_v19 = vpop.f32.mrf.mxu2  ;;  %v414_v20 = vpop.f32.mrf.mxu3 }
  0xc9   : > { %v345_v21 = vpop.f32.mrf.mxu0  ;;  %v369_v22 = vpop.f32.mrf.mxu1  ;;  %v391_v31 = vadd.f32 %v1006_v42, %v390_v19  ;;  %v415_v32 = vadd.f32 %v1006_v42, %v414_v20 }
  0xca   : > { %v346_v25 = vadd.f32 %v1006_v42, %v345_v21  ;;  %v370_v26 = vadd.f32 %v1006_v42, %v369_v22 }
  0xcc   : > { %v626_v27 = vpack.c.bf16 %v346_v25, %v343_v23  ;;  %v646_v28 = vpack.c.bf16 %v370_v26, %v367_v24 }
  0xce   : > { %694 = vst [vmem:[%s1014_s4 + $0x10] sm:$0xff] %v626_v27  }
  0xcf   : > { %698 = vst [vmem:[%s1014_s4 + $0x30] sm:$0xff] %v646_v28  }
  0xd0   : > { %v393_v29 = vpop.f32.mrf.mxu2  ;;  %v417_v30 = vpop.f32.mrf.mxu3 }
  0xd1   : > { %v394_v33 = vadd.f32 %v1006_v42, %v393_v29  ;;  %v418_v34 = vadd.f32 %v1006_v42, %v417_v30  ;;  %v348_v35 = vpop.f32.mrf.mxu0  ;;  %v372_v36 = vpop.f32.mrf.mxu1 }
  0xd2   : > { %v349_v44 = vadd.f32 %v1006_v42, %v348_v35  ;;  %v373_v45 = vadd.f32 %v1006_v42, %v372_v36 }
  0xd3   : > { %v666_v37 = vpack.c.bf16 %v394_v33, %v391_v31  ;;  %v686_v38 = vpack.c.bf16 %v418_v34, %v415_v32 }
  0xd5   : > { %702 = vst [vmem:[%s1014_s4 + $0x50] sm:$0xff] %v666_v37  }
  0xd6   : > { %706 = vst [vmem:[%s1014_s4 + $0x70] sm:$0xff] %v686_v38  }
  0xd8   : > { %v396_v39 = vpop.f32.mrf.mxu2  ;;  %v420_v40 = vpop.f32.mrf.mxu3 }
  0xd9   : > { %v351_v41 = vpop.f32.mrf.mxu0  ;;  %v375_v43 = vpop.f32.mrf.mxu1  ;;  %v397_v52 = vadd.f32 %v1006_v42, %v396_v39  ;;  %v421_v53 = vadd.f32 %v1006_v42, %v420_v40 }
  0xda   : > { %v352_v46 = vadd.f32 %v1006_v42, %v351_v41  ;;  %v376_v47 = vadd.f32 %v1006_v42, %v375_v43 }
  0xdc   : > { %v631_v48 = vpack.c.bf16 %v352_v46, %v349_v44  ;;  %v651_v49 = vpack.c.bf16 %v376_v47, %v373_v45 }
  0xde   : > { %695 = vst [vmem:[%s1014_s4 + $0x18] sm:$0xff] %v631_v48  }
  0xdf   : > { %699 = vst [vmem:[%s1014_s4 + $0x38] sm:$0xff] %v651_v49  }
  0xe0   : > { %v399_v50 = vpop.f32.mrf.mxu2  ;;  %v423_v51 = vpop.f32.mrf.mxu3 }
  0xe1   : > { %v400_v54 = vadd.f32 %v1006_v42, %v399_v50  ;;  %v424_v55 = vadd.f32 %v1006_v42, %v423_v51 }
  0xe3   : > { %v671_v56 = vpack.c.bf16 %v400_v54, %v397_v52  ;;  %v691_v57 = vpack.c.bf16 %v424_v55, %v421_v53 }
  0xe5   : > { %703 = vst [vmem:[%s1014_s4 + $0x58] sm:$0xff] %v671_v56  }
  0xe6   : > { %707 = vst [vmem:[%s1014_s4 + $0x78] sm:$0xff] %v691_v57  }
  0xe7   : > { %801 = shalt.err (!%p798_p3)
}
  0xe8   : > { %s838_s27 = smov 64   ;;  %s839_s28 = smov 4  }
  0xe9   : > { %732 = dma.vmem_to_hbm [thread:$0]  (%p898_p5), %s504_s9, 2048, %s506_s10, %s491_s16, %s838_s27, %s838_s27, %s839_s28  }
  0xea PF: > { %p738_p4 = scmp.ge.s32.totalorder %s836_s15, 2  ;;  %s520_s29 = sand.u32 1, %s824_s12  }
  0xeb   : > { %s521_s30 = scalar_lea.sflag [#allocation3], %s520_s29 }
  0xec   : > { %p735_p7 = pnand %p738_p4, %p902_p6 }
  0xee   : > { %p736_p8 = pneg %p735_p7 }
  0xf0   : > { %819 = dma.done.wait (%p736_p8), %s521_s30, 2048  }
  0xf1   : > { %821 = vsyncadd (%p736_p8), %s521_s30, 4294965248  ;;  %p13_p9 = scmp.ge.s32.totalorder %s885_s18, 6   ;;  %s1100_s12 = smov %s828_s13 }
  0xf2   : > { %s1101_s13 = smov %s832_s14  ;;  %s1102_s14 = smov %s896_s21 }
  0xf3   : > { %s1103_s15 = smov %s885_s18  ;;  %15 = sbr.rel (!%p13_p9) target bundleno = 3 (0x3), region = 67 }
  0xf8   :  { %527 = vsyncpa [#allocation3], 1 }
  0xf9   :  { %529 = vsyncpa [#allocation3 + $0x1], 1 }

</bundles_post_ra>
